<compile_context>
chip_gen: v5e
topology: v5e:2x2
jax: 0.10.0
libtpu: 0.0.40
codegen_flags: <defaults>
</compile_context>

<pallas_src>
from functools import partial

import jax
import jax.numpy as jnp
from jax.experimental import pallas as pl
from jax.experimental.pallas import tpu as pltpu


def _te_kernel(scale_ref, year_ref, day_ref, wy_ref, wd_ref, out_ref,
               *scratch, hy: int, hd: int, tpf: int, bu: int):
    """One block of `bu` unique (year, day-of-year) rows.

    scale_ref : SMEM (1,)          f32
    year_ref  : VMEM (bu, 1)       f32
    day_ref   : VMEM (bu, 1)       f32
    wy_ref    : VMEM (1, hy)       f32   omega for the year half
    wd_ref    : VMEM (1, hd)       f32   omega for the day half
    out_ref   : VMEM (bu*tpf, D)   out dtype, D = 2*(hy+hd)
    scratch   : (emb_ref,) VMEM (bu, D) f32, only when tpf > 1
    """
    scale = scale_ref[0]
    year = year_ref[...]                      # (bu, 1)
    day = day_ref[...]                        # (bu, 1)

    # Half-width arguments — bit-exact w.r.t. the reference einsum('m,d->md').
    arg_y = year * wy_ref[...]                # (bu, hy)
    arg_d = day * wd_ref[...]                 # (bu, hd)

    # D transcendental lane-evaluations per row total (was 2*D with where()).
    sy = scale * jnp.sin(arg_y)
    cy = scale * jnp.cos(arg_y)
    sd = scale * jnp.sin(arg_d)
    cd = scale * jnp.cos(arg_d)

    d_total = 2 * (hy + hd)
    odt = out_ref.dtype

    if tpf == 1:
        # Direct lane sub-slice stores; block is fully covered.
        out_ref[:, 0:hy] = sy.astype(odt)
        out_ref[:, hy:2 * hy] = cy.astype(odt)
        out_ref[:, 2 * hy:2 * hy + hd] = sd.astype(odt)
        out_ref[:, 2 * hy + hd:d_total] = cd.astype(odt)
    else:
        # Compute once into scratch, then replicate each row tpf times into the
        # output block (fused repeat_interleave; no recompute per token).
        emb_ref = scratch[0]
        emb_ref[:, 0:hy] = sy
        emb_ref[:, hy:2 * hy] = cy
        emb_ref[:, 2 * hy:2 * hy + hd] = sd
        emb_ref[:, 2 * hy + hd:d_total] = cd
        for r in range(bu):                   # static unroll; bu kept small
            row = emb_ref[pl.ds(r, 1), :]     # (1, D)
            out_ref[pl.ds(r * tpf, tpf), :] = jnp.broadcast_to(
                row, (tpf, d_total)).astype(odt)


def _choose_block_rows(m_unique: int, tpf: int, embed_dim: int,
                       max_out_block_bytes: int) -> int:
    """Rows of *unique* coords per grid step."""
    if m_unique <= 8:
        return m_unique                       # block dim == full array dim
    bytes_per_unique_row = tpf * embed_dim * 4
    cap = max(8, ((max_out_block_bytes // bytes_per_unique_row) // 8) * 8)
    if tpf > 1:
        cap = min(cap, 128)                   # bound the static replicate unroll
    bu = min(cap, (m_unique // 8) * 8)
    # v7x megacore: prefer >= 2 grid steps so both TensorCores get work.
    two_step = ((pl.cdiv(m_unique, 2) + 7) // 8) * 8
    if bu >= m_unique and two_step < m_unique:
        bu = min(bu, two_step)
    return max(8, bu)


def temporal_encoder_forward(temporal_coords: jnp.ndarray,
                             embed_dim: int,
                             scale: jnp.ndarray,
                             tokens_per_frame=None,
                             out_dtype=jnp.float32,
                             max_out_block_bytes: int = 8 * 1024 * 1024):
    """JAX/Pallas equivalent of TemporalEncoder.forward.

    temporal_coords: (B, T, 2) float32 (year, day-of-year)
    returns (B, T, embed_dim) or (B, T*tokens_per_frame, embed_dim).
    """
    B, T, C = temporal_coords.shape
    assert C == 2
    year_dim = embed_dim // 2
    day_dim = embed_dim - year_dim
    assert year_dim % 2 == 0 and day_dim % 2 == 0
    hy, hd = year_dim // 2, day_dim // 2

    tpf = 1 if tokens_per_frame is None else int(tokens_per_frame)
    m_unique = B * T
    m_out = m_unique * tpf

    coords = temporal_coords.astype(jnp.float32).reshape(m_unique, 2)
    year = coords[:, 0:1]                      # (M, 1)
    day = coords[:, 1:2]                       # (M, 1)

    omega_y = (1.0 / (10000.0 ** (jnp.arange(hy, dtype=jnp.float32)
                                  / float(hy)))).reshape(1, hy)
    omega_d = (1.0 / (10000.0 ** (jnp.arange(hd, dtype=jnp.float32)
                                  / float(hd)))).reshape(1, hd)
    scale_arr = jnp.asarray(scale, dtype=jnp.float32).reshape(1)

    bu = _choose_block_rows(m_unique, tpf, embed_dim, max_out_block_bytes)
    grid = (int(pl.cdiv(m_unique, bu)),)       # ragged last block is masked
    out_rows_blk = bu * tpf

    out_block_bytes = out_rows_blk * embed_dim * jnp.dtype(out_dtype).itemsize
    scratch_bytes = bu * embed_dim * 4 if tpf > 1 else 0
    vmem_limit = int(min(64 * 1024 * 1024,
                         max(16 * 1024 * 1024,
                             2 * out_block_bytes + scratch_bytes + (1 << 20))))

    scratch_shapes = ([pltpu.VMEM((bu, embed_dim), jnp.float32)]
                      if tpf > 1 else [])

    kern = partial(_te_kernel, hy=hy, hd=hd, tpf=tpf, bu=bu)

    out = pl.pallas_call(
        kern,
        out_shape=jax.ShapeDtypeStruct((m_out, embed_dim), out_dtype),
        grid_spec=pltpu.PrefetchScalarGridSpec(
            num_scalar_prefetch=0,
            grid=grid,
            in_specs=[
                pl.BlockSpec((1,), lambda i: (0,),
                             memory_space=pltpu.SMEM),            # scale
                pl.BlockSpec((bu, 1), lambda i: (i, 0)),           # year col
                pl.BlockSpec((bu, 1), lambda i: (i, 0)),           # day col
                pl.BlockSpec((1, hy), lambda i: (0, 0)),           # omega_year
                pl.BlockSpec((1, hd), lambda i: (0, 0)),           # omega_day
            ],
            out_specs=pl.BlockSpec((out_rows_blk, embed_dim),
                                   lambda i: (i, 0)),
            scratch_shapes=scratch_shapes,
        ),
        compiler_params=pltpu.CompilerParams(
            dimension_semantics=("parallel",),
            vmem_limit_bytes=vmem_limit),
    )(scale_arr, year, day, omega_y, omega_d)

    if tokens_per_frame is not None:
        return out.reshape(B, T * tpf, embed_dim)
    return out.reshape(B, T, embed_dim)


def _reference_forward(temporal_coords, embed_dim, scale, tokens_per_frame=None):
    """Pure-JAX reference mirroring the PyTorch module (for verification)."""
    B, T, _ = temporal_coords.shape
    year_embed_dim = embed_dim // 2
    julian_day_embed_dim = embed_dim - year_embed_dim

    def sincos(d, pos):
        omega = jnp.arange(d // 2, dtype=jnp.float32) / (d / 2.0)
        omega = 1.0 / (10000.0 ** omega)
        out = jnp.einsum('m,d->md', pos.reshape(-1), omega)
        return jnp.concatenate([jnp.sin(out), jnp.cos(out)], axis=1)

    year = sincos(year_embed_dim,
                  temporal_coords[:, :, 0].reshape(-1)).reshape(B, T, -1)
    day = sincos(julian_day_embed_dim,
                 temporal_coords[:, :, 1].reshape(-1)).reshape(B, T, -1)
    emb = scale.reshape(()) * jnp.concatenate([year, day], axis=-1)
    if tokens_per_frame is not None:
        emb = jnp.repeat(emb, tokens_per_frame, axis=1)
    return emb


if __name__ == "__main__":
    key = jax.random.PRNGKey(0)
    k_year, k_day = jax.random.split(key)

    B, T = 2, 8
    embed_dim = 32
    tokens_per_frame = 4

    # trainable_scale=False -> scale buffer of ones.
    scale = jnp.ones((1,), dtype=jnp.float32)

    years = jax.random.randint(k_year, (B, T), 2000, 2024).astype(jnp.float32)
    days = jax.random.randint(k_day, (B, T), 1, 366).astype(jnp.float32)
    temporal_coords = jnp.stack([years, days], axis=-1)   # (B, T, 2)

    # Case 1: tokens_per_frame (repeat_interleave fused + replicated in-kernel)
    out = temporal_encoder_forward(temporal_coords, embed_dim, scale,
                                   tokens_per_frame=tokens_per_frame)
    out = jax.block_until_ready(out)
    ref = _reference_forward(temporal_coords, embed_dim, scale,
                             tokens_per_frame=tokens_per_frame)
    assert out.shape == (B, T * tokens_per_frame, embed_dim), out.shape
    assert jnp.allclose(out, ref, atol=1e-5, rtol=1e-5), "mismatch (tpf case)"

    # Case 2: no tokens_per_frame
    out2 = temporal_encoder_forward(temporal_coords, embed_dim, scale,
                                    tokens_per_frame=None)
    out2 = jax.block_until_ready(out2)
    ref2 = _reference_forward(temporal_coords, embed_dim, scale,
                              tokens_per_frame=None)
    assert out2.shape == (B, T, embed_dim), out2.shape
    assert jnp.allclose(out2, ref2, atol=1e-5, rtol=1e-5), "mismatch (base case)"

    # Case 3: ragged grid (block rows do not divide B*T) — exercises the
    # no-pad / no-slice path where Pallas masks the last block.
    B3, T3 = 3, 3
    years3 = jax.random.randint(k_year, (B3, T3), 2000, 2024).astype(jnp.float32)
    days3 = jax.random.randint(k_day, (B3, T3), 1, 366).astype(jnp.float32)
    coords3 = jnp.stack([years3, days3], axis=-1)
    out3 = temporal_encoder_forward(coords3, embed_dim, scale,
                                    tokens_per_frame=None)
    out3 = jax.block_until_ready(out3)
    ref3 = _reference_forward(coords3, embed_dim, scale, tokens_per_frame=None)
    assert out3.shape == (B3, T3, embed_dim), out3.shape
    assert jnp.allclose(out3, ref3, atol=1e-5, rtol=1e-5), "mismatch (ragged case)"

    print("KERNEL_OK")
</pallas_src>

<mosaic_0001>
module attributes {stable_mosaic.version = 11 : i64} {
  func.func @_te_kernel(%arg0: i32, %arg1: memref<1xf32, #tpu.memory_space<smem>>, %arg2: memref<8x1xf32, #tpu.memory_space<vmem>>, %arg3: memref<8x1xf32, #tpu.memory_space<vmem>>, %arg4: memref<1x8xf32, #tpu.memory_space<vmem>>, %arg5: memref<1x8xf32, #tpu.memory_space<vmem>>, %arg6: memref<32x32xf32, #tpu.memory_space<vmem>>, %arg7: memref<8x32xf32, #tpu.memory_space<vmem>>) attributes {dimension_semantics = [#tpu.dimension_semantics<parallel>], iteration_bounds = array<i64: 2>, scalar_prefetch = 0 : i64, scratch_operands = 1 : i64, tpu.core_type = #tpu.core_type<tc>, window_params = [{transform_indices = @transform_0, window_bounds = array<i64: 1>}, {transform_indices = @transform_1, window_bounds = array<i64: 8, 1>}, {transform_indices = @transform_2, window_bounds = array<i64: 8, 1>}, {pipeline_mode = #tpu.pipeline_mode<synchronous>, transform_indices = @transform_3, window_bounds = array<i64: 1, 8>}, {pipeline_mode = #tpu.pipeline_mode<synchronous>, transform_indices = @transform_4, window_bounds = array<i64: 1, 8>}, {transform_indices = @transform_5, window_bounds = array<i64: 32, 32>}]} {
    %c0 = arith.constant 0 : index
    %0 = memref.load %arg1[%c0] : memref<1xf32, #tpu.memory_space<smem>>
    %c0_0 = arith.constant 0 : index
    %c0_1 = arith.constant 0 : index
    %1 = vector.load %arg2[%c0_0, %c0_1] : memref<8x1xf32, #tpu.memory_space<vmem>>, vector<8x1xf32>
    %c0_2 = arith.constant 0 : index
    %c0_3 = arith.constant 0 : index
    %2 = vector.load %arg3[%c0_2, %c0_3] : memref<8x1xf32, #tpu.memory_space<vmem>>, vector<8x1xf32>
    %c0_4 = arith.constant 0 : index
    %c0_5 = arith.constant 0 : index
    %3 = vector.load %arg4[%c0_4, %c0_5] : memref<1x8xf32, #tpu.memory_space<vmem>>, vector<1x8xf32>
    %4 = vector.broadcast %1 : vector<8x1xf32> to vector<8x8xf32>
    %5 = vector.broadcast %3 : vector<1x8xf32> to vector<8x8xf32>
    %6 = arith.mulf %4, %5 : vector<8x8xf32>
    %c0_6 = arith.constant 0 : index
    %c0_7 = arith.constant 0 : index
    %7 = vector.load %arg5[%c0_6, %c0_7] : memref<1x8xf32, #tpu.memory_space<vmem>>, vector<1x8xf32>
    %8 = vector.broadcast %2 : vector<8x1xf32> to vector<8x8xf32>
    %9 = vector.broadcast %7 : vector<1x8xf32> to vector<8x8xf32>
    %10 = arith.mulf %8, %9 : vector<8x8xf32>
    %11 = math.sin %6 : vector<8x8xf32>
    %12 = vector.broadcast %0 : f32 to vector<8x8xf32>
    %13 = arith.mulf %12, %11 : vector<8x8xf32>
    %14 = math.cos %6 : vector<8x8xf32>
    %15 = vector.broadcast %0 : f32 to vector<8x8xf32>
    %16 = arith.mulf %15, %14 : vector<8x8xf32>
    %17 = math.sin %10 : vector<8x8xf32>
    %18 = vector.broadcast %0 : f32 to vector<8x8xf32>
    %19 = arith.mulf %18, %17 : vector<8x8xf32>
    %20 = math.cos %10 : vector<8x8xf32>
    %21 = vector.broadcast %0 : f32 to vector<8x8xf32>
    %22 = arith.mulf %21, %20 : vector<8x8xf32>
    %c0_8 = arith.constant 0 : index
    %c0_9 = arith.constant 0 : index
    %23 = vector.load %arg7[%c0_8, %c0_9] : memref<8x32xf32, #tpu.memory_space<vmem>>, vector<8x8xf32>
    tpu.vector_store %arg7[%c0_8, %c0_9], %13 {strides = array<i32>} : memref<8x32xf32, #tpu.memory_space<vmem>>, vector<8x8xf32>,
    %c0_10 = arith.constant 0 : index
    %c8 = arith.constant 8 : index
    %24 = vector.load %arg7[%c0_10, %c8] : memref<8x32xf32, #tpu.memory_space<vmem>>, vector<8x8xf32>
    tpu.vector_store %arg7[%c0_10, %c8], %16 {strides = array<i32>} : memref<8x32xf32, #tpu.memory_space<vmem>>, vector<8x8xf32>,
    %c0_11 = arith.constant 0 : index
    %c16 = arith.constant 16 : index
    %25 = vector.load %arg7[%c0_11, %c16] : memref<8x32xf32, #tpu.memory_space<vmem>>, vector<8x8xf32>
    tpu.vector_store %arg7[%c0_11, %c16], %19 {strides = array<i32>} : memref<8x32xf32, #tpu.memory_space<vmem>>, vector<8x8xf32>,
    %c0_12 = arith.constant 0 : index
    %c24 = arith.constant 24 : index
    %26 = vector.load %arg7[%c0_12, %c24] : memref<8x32xf32, #tpu.memory_space<vmem>>, vector<8x8xf32>
    tpu.vector_store %arg7[%c0_12, %c24], %22 {strides = array<i32>} : memref<8x32xf32, #tpu.memory_space<vmem>>, vector<8x8xf32>,
    %c0_13 = arith.constant 0 : index
    %c0_14 = arith.constant 0 : index
    %27 = vector.load %arg7[%c0_13, %c0_14] : memref<8x32xf32, #tpu.memory_space<vmem>>, vector<1x32xf32>
    %28 = vector.shape_cast %27 : vector<1x32xf32> to vector<1x32xf32>
    %29 = vector.broadcast %28 : vector<1x32xf32> to vector<4x32xf32>
    %c0_15 = arith.constant 0 : index
    %c0_16 = arith.constant 0 : index
    %30 = vector.load %arg6[%c0_15, %c0_16] : memref<32x32xf32, #tpu.memory_space<vmem>>, vector<4x32xf32>
    tpu.vector_store %arg6[%c0_15, %c0_16], %29 {strides = array<i32>} : memref<32x32xf32, #tpu.memory_space<vmem>>, vector<4x32xf32>,
    %c1 = arith.constant 1 : index
    %c0_17 = arith.constant 0 : index
    %31 = vector.load %arg7[%c1, %c0_17] : memref<8x32xf32, #tpu.memory_space<vmem>>, vector<1x32xf32>
    %32 = vector.shape_cast %31 : vector<1x32xf32> to vector<1x32xf32>
    %33 = vector.broadcast %32 : vector<1x32xf32> to vector<4x32xf32>
    %c4 = arith.constant 4 : index
    %c0_18 = arith.constant 0 : index
    %34 = vector.load %arg6[%c4, %c0_18] : memref<32x32xf32, #tpu.memory_space<vmem>>, vector<4x32xf32>
    tpu.vector_store %arg6[%c4, %c0_18], %33 {strides = array<i32>} : memref<32x32xf32, #tpu.memory_space<vmem>>, vector<4x32xf32>,
    %c2 = arith.constant 2 : index
    %c0_19 = arith.constant 0 : index
    %35 = vector.load %arg7[%c2, %c0_19] : memref<8x32xf32, #tpu.memory_space<vmem>>, vector<1x32xf32>
    %36 = vector.shape_cast %35 : vector<1x32xf32> to vector<1x32xf32>
    %37 = vector.broadcast %36 : vector<1x32xf32> to vector<4x32xf32>
    %c8_20 = arith.constant 8 : index
    %c0_21 = arith.constant 0 : index
    %38 = vector.load %arg6[%c8_20, %c0_21] : memref<32x32xf32, #tpu.memory_space<vmem>>, vector<4x32xf32>
    tpu.vector_store %arg6[%c8_20, %c0_21], %37 {strides = array<i32>} : memref<32x32xf32, #tpu.memory_space<vmem>>, vector<4x32xf32>,
    %c3 = arith.constant 3 : index
    %c0_22 = arith.constant 0 : index
    %39 = vector.load %arg7[%c3, %c0_22] : memref<8x32xf32, #tpu.memory_space<vmem>>, vector<1x32xf32>
    %40 = vector.shape_cast %39 : vector<1x32xf32> to vector<1x32xf32>
    %41 = vector.broadcast %40 : vector<1x32xf32> to vector<4x32xf32>
    %c12 = arith.constant 12 : index
    %c0_23 = arith.constant 0 : index
    %42 = vector.load %arg6[%c12, %c0_23] : memref<32x32xf32, #tpu.memory_space<vmem>>, vector<4x32xf32>
    tpu.vector_store %arg6[%c12, %c0_23], %41 {strides = array<i32>} : memref<32x32xf32, #tpu.memory_space<vmem>>, vector<4x32xf32>,
    %c4_24 = arith.constant 4 : index
    %c0_25 = arith.constant 0 : index
    %43 = vector.load %arg7[%c4_24, %c0_25] : memref<8x32xf32, #tpu.memory_space<vmem>>, vector<1x32xf32>
    %44 = vector.shape_cast %43 : vector<1x32xf32> to vector<1x32xf32>
    %45 = vector.broadcast %44 : vector<1x32xf32> to vector<4x32xf32>
    %c16_26 = arith.constant 16 : index
    %c0_27 = arith.constant 0 : index
    %46 = vector.load %arg6[%c16_26, %c0_27] : memref<32x32xf32, #tpu.memory_space<vmem>>, vector<4x32xf32>
    tpu.vector_store %arg6[%c16_26, %c0_27], %45 {strides = array<i32>} : memref<32x32xf32, #tpu.memory_space<vmem>>, vector<4x32xf32>,
    %c5 = arith.constant 5 : index
    %c0_28 = arith.constant 0 : index
    %47 = vector.load %arg7[%c5, %c0_28] : memref<8x32xf32, #tpu.memory_space<vmem>>, vector<1x32xf32>
    %48 = vector.shape_cast %47 : vector<1x32xf32> to vector<1x32xf32>
    %49 = vector.broadcast %48 : vector<1x32xf32> to vector<4x32xf32>
    %c20 = arith.constant 20 : index
    %c0_29 = arith.constant 0 : index
    %50 = vector.load %arg6[%c20, %c0_29] : memref<32x32xf32, #tpu.memory_space<vmem>>, vector<4x32xf32>
    tpu.vector_store %arg6[%c20, %c0_29], %49 {strides = array<i32>} : memref<32x32xf32, #tpu.memory_space<vmem>>, vector<4x32xf32>,
    %c6 = arith.constant 6 : index
    %c0_30 = arith.constant 0 : index
    %51 = vector.load %arg7[%c6, %c0_30] : memref<8x32xf32, #tpu.memory_space<vmem>>, vector<1x32xf32>
    %52 = vector.shape_cast %51 : vector<1x32xf32> to vector<1x32xf32>
    %53 = vector.broadcast %52 : vector<1x32xf32> to vector<4x32xf32>
    %c24_31 = arith.constant 24 : index
    %c0_32 = arith.constant 0 : index
    %54 = vector.load %arg6[%c24_31, %c0_32] : memref<32x32xf32, #tpu.memory_space<vmem>>, vector<4x32xf32>
    tpu.vector_store %arg6[%c24_31, %c0_32], %53 {strides = array<i32>} : memref<32x32xf32, #tpu.memory_space<vmem>>, vector<4x32xf32>,
    %c7 = arith.constant 7 : index
    %c0_33 = arith.constant 0 : index
    %55 = vector.load %arg7[%c7, %c0_33] : memref<8x32xf32, #tpu.memory_space<vmem>>, vector<1x32xf32>
    %56 = vector.shape_cast %55 : vector<1x32xf32> to vector<1x32xf32>
    %57 = vector.broadcast %56 : vector<1x32xf32> to vector<4x32xf32>
    %c28 = arith.constant 28 : index
    %c0_34 = arith.constant 0 : index
    %58 = vector.load %arg6[%c28, %c0_34] : memref<32x32xf32, #tpu.memory_space<vmem>>, vector<4x32xf32>
    tpu.vector_store %arg6[%c28, %c0_34], %57 {strides = array<i32>} : memref<32x32xf32, #tpu.memory_space<vmem>>, vector<4x32xf32>,
    return
  }
  func.func @transform_0(%arg0: i32) -> i32 {
    %c0_i32 = arith.constant 0 : i32
    %c0_i32_0 = arith.constant 0 : i32
    return %c0_i32 : i32
  }
  func.func @transform_1(%arg0: i32) -> (i32, i32) {
    %c0_i32 = arith.constant 0 : i32
    %c0_i32_0 = arith.constant 0 : i32
    return %arg0, %c0_i32 : i32, i32
  }
  func.func @transform_2(%arg0: i32) -> (i32, i32) {
    %c0_i32 = arith.constant 0 : i32
    %c0_i32_0 = arith.constant 0 : i32
    return %arg0, %c0_i32 : i32, i32
  }
  func.func @transform_3(%arg0: i32) -> (i32, i32) {
    %c0_i32 = arith.constant 0 : i32
    %c0_i32_0 = arith.constant 0 : i32
    %c0_i32_1 = arith.constant 0 : i32
    return %c0_i32, %c0_i32_0 : i32, i32
  }
  func.func @transform_4(%arg0: i32) -> (i32, i32) {
    %c0_i32 = arith.constant 0 : i32
    %c0_i32_0 = arith.constant 0 : i32
    %c0_i32_1 = arith.constant 0 : i32
    return %c0_i32, %c0_i32_0 : i32, i32
  }
  func.func @transform_5(%arg0: i32) -> (i32, i32) {
    %c0_i32 = arith.constant 0 : i32
    %c0_i32_0 = arith.constant 0 : i32
    return %arg0, %c0_i32 : i32, i32
  }
}

</mosaic_0001>

<bundles_post_ra>
// kernel: tpu_custom_call.1
= control target key start
LH: loop header
LB: loop body
LE: loop exit
PB: predicated region body
PF: predicated region fallthrough
CT: control target
= control target key end

     0   :  { %s1103_s20 = smov 0   ;;  %s1280_s0 = inlined_call_operand.<no memory space> [shape: f32[1], index: 0, kind: input, shape index: {}]   ;;  %s1281_s1 = inlined_call_operand.vmem [shape: f32[16,1], index: 1, kind: input, shape index: {}]   ;;  %s1282_s2 = inlined_call_operand.vmem [shape: f32[16,1], index: 2, kind: input, shape index: {}]   ;;  %s1283_s3 = inlined_call_operand.vmem [shape: f32[1,8], index: 3, kind: input, shape index: {}]   ;;  %s1284_s4 = inlined_call_operand.vmem [shape: f32[1,8], index: 4, kind: input, shape index: {}]   ;;  %s1285_s5 = inlined_call_operand.vmem [shape: f32[64,32], index: 5, kind: output, shape index: {}]  }
   0x1   :  { %10 = sst [smem:[#allocation3]] %s1280_s0 }
   0x2 LB: > { %s1109_s21 = sadd.s32 4294967295, %s1058_s20   ;;  %p1004_p0 = scmp.ge.s32.totalorder %s1058_s20, 1  ;;  %s1058_s20 = sphi %s1103_s20, %s16_s20  }
   0x3   : > { %p196_p1 = scmp.lt.s32.totalorder %s1058_s20, 3 }
   0x5   : > { %p197_p2 = pnand %p1004_p0, %p196_p1 }
   0x6   : > { %p227_p3 = scmp.lt.s32.totalorder (!%p197_p2), %s1109_s21, 1  ;;  %s241_s8 = sld [smem:[#allocation3]] (!%p197_p2) }
   0x7   : > { %200 = sbr.rel (%p197_p2) target bundleno = 383 (0x17f), region = 40  ;;  %s1067_s9 = smov (!%p197_p2), 8  }
   0x8   : > { %s1068_s10 = smov (!%p197_p2), 24   ;;  %s1069_s11 = smov (!%p197_p2), 16  }
   0x9   : > { %s1007_s12 = sshll.u32 (!%p197_p2), %s1109_s21, 2 }
   0xa   : > { %p236_p4 = scmp.lt.s32.totalorder (!%p197_p2), %s1007_s12, 7 }
   0xc   : > { %v1060_v0 = vmov 0   ;;  %s228_s0 = scalar_select %p227_p3, %s1109_s21, 1  ;;  %v1042_v3 = vld [vmem:[%s1283_s3] ss:$0 sm:$0xff]  ;;  %v1061_v24 = vmov 683565275  }
   0xd   : > { %1041 = vset.pattern.permute.xlu0 %v1060_v0  ;;  %v1043_v9 = vld [vmem:[%s1284_s4] ss:$0 sm:$0xff]  ;;  %v1062_v26 = vmov 2475754826   ;;  %v1063_v30 = vmov 2131351028  }
   0xe   : > { %s1005_s22 = sshll.u32 %s228_s0, 3  ;;  %v1064_v33 = vmov 2102212464   ;;  %v1065_v36 = vmov 920167782   ;;  %s1289_s12 = smov (!%p236_p4, %s1007_s12), 7 }
   0xf   : > { %s230_s25 = scalar_lea.vmem %s1281_s1, %s1005_s22  ;;  %s234_s28 = scalar_lea.vmem %s1282_s2, %s1005_s22  ;;  %v1066_v39 = vmov 1326507024  }
  0x10   : > { %v242_v1 = vld [vmem:[%s230_s25] sm:$0xff]  ;;  %s1008_s13 = sshll.u32 %s1289_s12, 3 }
  0x11   : > { %247 = vperm.xlu0 %1041, %v242_v1   ;;  %v243_v2 = vld [vmem:[%s234_s28] sm:$0xff]  ;;  %s239_s16 = scalar_lea.vmem %s1285_s5, %s1008_s13 }
  0x19   : > { %257 = vperm.xlu0 %1041, %v243_v2  }
  0x83   : > { %v248_v4 = vpop.permute.xlu0 %247 }
  0x84   : > { %v1125_v5 = vmul.f32 %v1042_v3, %v248_v4 }
  0x86   : > { %v264_v6 = vand.u32 2147483647, %v1125_v5  ;;  %v267_v7 = vand.u32 2139095040, %v1125_v5 }
  0x88   : > { %v268_v8 = vshrl.u32 %v267_v7, 23  ;;  %v271_v11 = vand.u32 8388607, %v264_v6 }
  0x8a   : > { %v1009_v10 = vadd.s32 4294967169, %v268_v8  ;;  %v272_v15 = vor.u32 8388608, %v271_v11 }
  0x8b   : > { %v258_v12 = vpop.permute.xlu0 %257 }
  0x8c   : > { %v274_v13 = vadd.s32 1, %v1009_v10  ;;  %v1134_v14 = vmul.f32 %v1043_v9, %v258_v12  ;;  %v1138_v21 = vshll.u32 %v272_v15, 8 }
  0x8e   : > { %vm275_vm0 = vcmp.gt.s32.totalorder %v274_v13, 0  ;;  %v576_v17 = vand.u32 2147483647, %v1134_v14  ;;  %v579_v18 = vand.u32 2139095040, %v1134_v14  ;;  %v313_v60 = vand.u32 65535, %v1138_v21 }
  0x8f   : > { %v276_v16 = vsel %vm275_vm0, %v274_v13, 0  ;;  %v314_v4 = vshrl.u32 %v1138_v21, 16 }
  0x90   : > { %v278_v19 = vand.u32 31, %v276_v16  ;;  %v580_v22 = vshrl.u32 %v579_v18, 23  ;;  %v277_v23 = vshrl.u32 %v276_v16, 5  ;;  %v583_v28 = vand.u32 8388607, %v576_v17 }
  0x92   : > { %v279_v20 = vsub.s32 32, %v278_v19  ;;  %v281_v25 = vshll.u32 %v1061_v24, %v278_v19  ;;  %v284_v27 = vshll.u32 %v1062_v26, %v278_v19  ;;  %v287_v32 = vshll.u32 %v1063_v30, %v278_v19 }
  0x93   : > { %v290_v35 = vshll.u32 %v1064_v33, %v278_v19  ;;  %v293_v38 = vshll.u32 %v1065_v36, %v278_v19  ;;  %v1015_v44 = vadd.s32 4294967169, %v580_v22  ;;  %vm296_vm1 = vcmp.lt.s32.totalorder %v277_v23, 1 }
  0x94   : > { %v282_v29 = vshrl.u32 %v1062_v26, %v279_v20  ;;  %v285_v31 = vshrl.u32 %v1063_v30, %v279_v20  ;;  %v288_v34 = vshrl.u32 %v1064_v33, %v279_v20  ;;  %v291_v37 = vshrl.u32 %v1065_v36, %v279_v20 }
  0x95   : > { %v294_v40 = vshrl.u32 %v1066_v39, %v279_v20  ;;  %vm299_vm2 = vcmp.lt.s32.totalorder %v277_v23, 4  ;;  %vm297_vm3 = vcmp.lt.s32.totalorder %v277_v23, 2  ;;  %vm298_vm4 = vcmp.lt.s32.totalorder %v277_v23, 3 }
  0x96   : > { %v283_v41 = vor.u32 %v282_v29, %v281_v25  ;;  %v286_v42 = vor.u32 %v285_v31, %v284_v27  ;;  %v289_v43 = vor.u32 %v288_v34, %v287_v32  ;;  %v292_v45 = vor.u32 %v291_v37, %v290_v35 }
  0x97   : > { %v295_v46 = vor.u32 %v294_v40, %v293_v38  ;;  %v584_v51 = vor.u32 8388608, %v583_v28  ;;  %v586_v52 = vadd.s32 1, %v1015_v44  ;;  %v280_v53 = vshrl.u32 %v1061_v24, %v279_v20 }
  0x98   : > { %v301_v47 = vsel %vm299_vm2, %v289_v43, 2102212464  ;;  %v308_v48 = vsel %vm296_vm1, %v286_v42, %v289_v43  ;;  %v305_v49 = vsel %vm299_vm2, %v292_v45, 920167782  ;;  %v304_v54 = vsel %vm296_vm1, %v283_v41, %v286_v42 }
  0x99   : > { %v309_v50 = vsel %vm299_vm2, %v295_v46, 1326507024  ;;  %v306_v55 = vsel %vm298_vm4, %v289_v43, %v305_v49  ;;  %vm587_vm5 = vcmp.gt.s32.totalorder %v586_v52, 0  ;;  %v300_v58 = vsel %vm296_vm1, %v280_v53, %v283_v41 }
  0x9a   : > { %v310_v56 = vsel %vm298_vm4, %v292_v45, %v309_v50  ;;  %v302_v59 = vsel %vm298_vm4, %v286_v42, %v301_v47  ;;  %v307_v62 = vsel %vm297_vm3, %v304_v54, %v306_v55  ;;  %v588_v1 = vsel %vm587_vm5, %v586_v52, 0 }
  0x9b   : > { %v311_v57 = vsel %vm297_vm3, %v308_v48, %v310_v56  ;;  %v1150_v2 = vshll.u32 %v584_v51, 8  ;;  %v590_v7 = vand.u32 31, %v588_v1  ;;  %v1156_v8 = vsel %vm297_vm3, %v300_v58, %v302_v59 }
  0x9c   : > { %v316_v61 = vshrl.u32 %v311_v57, 16  ;;  %v315_v63 = vand.u32 65535, %v311_v57  ;;  %v337_v9 = vand.u32 65535, %v307_v62  ;;  %v338_v10 = vshrl.u32 %v307_v62, 16 }
  0x9d   : > { %v1158_v13 = vsub.s32 32, %v590_v7  ;;  %v1161_v15 = vand.u32 65535, %v1150_v2  ;;  %v1164_v18 = vshrl.u32 %v588_v1, 5  ;;  %v593_v19 = vshll.u32 %v1061_v24, %v590_v7 }
  0x9e   : > { %v1152_v3 = vmul.u32 %v316_v61, %v313_v60  ;;  %v317_v11 = vmul.u32 %v315_v63, %v313_v60  ;;  %v320_v12 = vmul.u32 %v316_v61, %v314_v4  ;;  %v596_v20 = vshll.u32 %v1062_v26, %v590_v7 }
  0x9f   : > { %v594_v22 = vshrl.u32 %v1062_v26, %v1158_v13  ;;  %v597_v23 = vshrl.u32 %v1063_v30, %v1158_v13  ;;  %v599_v25 = vshll.u32 %v1063_v30, %v590_v7  ;;  %v600_v27 = vshrl.u32 %v1064_v33, %v1158_v13 }
  0xa0   : > { %v321_v16 = vshll.u32 %v1152_v3, 16  ;;  %v602_v28 = vshll.u32 %v1064_v33, %v590_v7  ;;  %v603_v29 = vshrl.u32 %v1065_v36, %v1158_v13  ;;  %v605_v31 = vshll.u32 %v1065_v36, %v590_v7 }
  0xa1   : > { %v606_v32 = vshrl.u32 %v1066_v39, %v1158_v13  ;;  %v1172_v34 = vor.u32 %v594_v22, %v593_v19  ;;  %v1174_v35 = vor.u32 %v597_v23, %v596_v20  ;;  %v1176_v37 = vor.u32 %v600_v27, %v599_v25 }
  0xa2   : > { %v319_v38 = vmul.u32 %v315_v63, %v314_v4  ;;  %vm325_vm6 = vc.u32 %v317_v11, %v321_v16  ;;  %v604_v26 = vor.u32 %v603_v29, %v602_v28  ;;  %vm608_vm7 = vcmp.lt.s32.totalorder %v1164_v18, 1 }
  0xa3   : > { %v607_v40 = vor.u32 %v606_v32, %v605_v31  ;;  %v340_v30 = vmul.u32 %v338_v10, %v313_v60  ;;  %vm611_vm8 = vcmp.lt.s32.totalorder %v1164_v18, 4  ;;  %v616_v33 = vsel %vm608_vm7, %v1172_v34, %v1174_v35 }
  0xa4   : > { %v620_v36 = vsel %vm608_vm7, %v1174_v35, %v1176_v37  ;;  %v327_v39 = vadd.s32 %v321_v16, %v317_v11  ;;  %vm610_vm9 = vcmp.lt.s32.totalorder %v1164_v18, 3  ;;  %v617_v41 = vsel %vm611_vm8, %v604_v26, 920167782 }
  0xa5   : > { %v621_v42 = vsel %vm611_vm8, %v607_v40, 1326507024  ;;  %vm609_vm10 = vcmp.lt.s32.totalorder %v1164_v18, 2  ;;  %v618_v43 = vsel %vm610_vm9, %v1176_v37, %v617_v41  ;;  %v326_v45 = vsel %vm325_vm6, 1, %v1060_v0 }
  0xa6   : > { %v622_v44 = vsel %vm610_vm9, %v604_v26, %v621_v42  ;;  %v619_v46 = vsel %vm609_vm10, %v616_v33, %v618_v43  ;;  %v323_v48 = vshll.u32 %v319_v38, 16  ;;  %v341_v49 = vmul.u32 %v337_v9, %v314_v4 }
  0xa7   : > { %v623_v47 = vsel %vm609_vm10, %v620_v36, %v622_v44  ;;  %v626_v50 = vshrl.u32 %v1150_v2, 16  ;;  %v328_v53 = vadd.s32 %v326_v45, %v320_v12  ;;  %v650_v54 = vshrl.u32 %v619_v46, 16 }
  0xa8   : > { %v627_v51 = vand.u32 65535, %v623_v47  ;;  %v628_v52 = vshrl.u32 %v623_v47, 16  ;;  %vm329_vm11 = vc.u32 %v327_v39, %v323_v48  ;;  %v339_v55 = vmul.u32 %v337_v9, %v313_v60 }
  0xa9   : > { %v343_v56 = vshll.u32 %v340_v30, 16  ;;  %v342_v57 = vmul.u32 %v338_v10, %v314_v4  ;;  %v649_v59 = vand.u32 65535, %v619_v46  ;;  %v322_v61 = vshrl.u32 %v1152_v3, 16 }
  0xaa   : > { %v630_v58 = vmul.u32 %v628_v52, %v1161_v15  ;;  %v629_v62 = vmul.u32 %v627_v51, %v1161_v15  ;;  %v330_v63 = vsel %vm329_vm11, 1, %v1060_v0  ;;  %v345_v1 = vshll.u32 %v341_v49, 16 }
  0xab   : > { %vm347_vm12 = vc.u32 %v339_v55, %v343_v56  ;;  %v332_v11 = vadd.s32 %v330_v63, %v328_v53  ;;  %v349_v16 = vadd.s32 %v343_v56, %v339_v55  ;;  %v652_v60 = vmul.u32 %v650_v54, %v1161_v15 }
  0xac   : > { %v633_v7 = vshll.u32 %v630_v58, 16  ;;  %v348_v12 = vsel %vm347_vm12, 1, %v1060_v0  ;;  %v324_v9 = vshrl.u32 %v319_v38, 16  ;;  %v631_v10 = vmul.u32 %v627_v51, %v626_v50 }
  0xad   : > { %v350_v4 = vadd.s32 %v348_v12, %v342_v57  ;;  %v333_v20 = vadd.s32 %v332_v11, %v322_v61  ;;  %vm351_vm14 = vc.u32 %v349_v16, %v345_v1  ;;  %v632_v3 = vmul.u32 %v628_v52, %v626_v50 }
  0xae   : > { %vm637_vm13 = vc.u32 %v629_v62, %v633_v7  ;;  %v639_v19 = vadd.s32 %v633_v7, %v629_v62  ;;  %v344_v22 = vshrl.u32 %v340_v30, 16  ;;  %v352_v23 = vsel %vm351_vm14, 1, %v1060_v0 }
  0xaf   : > { %v635_v25 = vshll.u32 %v631_v10, 16  ;;  %v354_v27 = vadd.s32 %v352_v23, %v350_v4  ;;  %v638_v28 = vsel %vm637_vm13, 1, %v1060_v0  ;;  %v651_v29 = vmul.u32 %v649_v59, %v1161_v15 }
  0xb0   : > { %v653_v31 = vmul.u32 %v649_v59, %v626_v50  ;;  %v334_v32 = vadd.s32 %v333_v20, %v324_v9  ;;  %v640_v26 = vadd.s32 %v638_v28, %v632_v3  ;;  %v655_v38 = vshll.u32 %v652_v60, 16 }
  0xb1   : > { %vm641_vm15 = vc.u32 %v639_v19, %v635_v25  ;;  %v654_v40 = vmul.u32 %v650_v54, %v626_v50  ;;  %v346_v33 = vshrl.u32 %v341_v49, 16  ;;  %v355_v36 = vadd.s32 %v354_v27, %v344_v22 }
  0xb2   : > { %v642_v39 = vsel %vm641_vm15, 1, %v1060_v0  ;;  %v353_v41 = vadd.s32 %v349_v16, %v345_v1  ;;  %v634_v30 = vshrl.u32 %v630_v58, 16  ;;  %vm659_vm0 = vc.u32 %v651_v29, %v655_v38 }
  0xb3   : > { %v644_v42 = vadd.s32 %v642_v39, %v640_v26  ;;  %v356_v43 = vadd.s32 %v355_v36, %v346_v33  ;;  %v657_v44 = vshll.u32 %v653_v31, 16  ;;  %v660_v45 = vsel %vm659_vm0, 1, %v1060_v0 }
  0xb4   : > { %v661_v46 = vadd.s32 %v655_v38, %v651_v29  ;;  %vm359_vm1 = vc.u32 %v334_v32, %v353_v41  ;;  %v662_v47 = vadd.s32 %v660_v45, %v654_v40  ;;  %v613_v48 = vsel %vm611_vm8, %v1176_v37, 2102212464 }
  0xb5   : > { %v645_v15 = vadd.s32 %v644_v42, %v634_v30  ;;  %v360_v49 = vadd.s32 1, %v356_v43  ;;  %v357_v50 = vmul.u32 %v1138_v21, %v1156_v8  ;;  %v592_v51 = vshrl.u32 %v1061_v24, %v1158_v13 }
  0xb6   : > { %vm663_vm2 = vc.u32 %v661_v46, %v657_v44  ;;  %v636_v52 = vshrl.u32 %v631_v10, 16  ;;  %v656_v55 = vshrl.u32 %v652_v60, 16  ;;  %v614_v37 = vsel %vm610_vm9, %v1174_v35, %v613_v48 }
  0xb7   : > { %v664_v53 = vsel %vm663_vm2, 1, %v1060_v0  ;;  %v361_v54 = vsel %vm359_vm1, %v360_v49, %v356_v43  ;;  %v612_v57 = vsel %vm608_vm7, %v592_v51, %v1172_v34  ;;  %v658_v21 = vshrl.u32 %v653_v31, 16 }
  0xb8   : > { %v666_v56 = vadd.s32 %v664_v53, %v662_v47  ;;  %v362_v58 = vadd.s32 %v361_v54, %v357_v50  ;;  %v646_v59 = vadd.s32 %v645_v15, %v636_v52  ;;  %v665_v24 = vadd.s32 %v661_v46, %v657_v44 }
  0xb9   : > { %v615_v0 = vsel %vm609_vm10, %v612_v57, %v614_v37  ;;  %v358_v3 = vadd.s32 %v353_v41, %v334_v32  ;;  %vm266_vm8 = vcmp.lt.s32.totalorder %v1125_v5, 0  ;;  %vm265_vm9 = vcmp.le.f32.partialorder %v264_v6, 0.7853982 }
  0xba   : > { %v667_v8 = vadd.s32 %v666_v56, %v656_v55  ;;  %v363_v61 = vadd.s32 536870912, %v362_v58  ;;  %vm671_vm3 = vc.u32 %v646_v59, %v665_v24  ;;  %v669_v1 = vmul.u32 %v1150_v2, %v615_v0 }
  0xbb   : > { %v670_v43 = vadd.s32 %v665_v24, %v646_v59  ;;  %vm578_vm10 = vcmp.lt.s32.totalorder %v1134_v14, 0  ;;  %vm1243_vm11 = vcmp.le.f32.partialorder %v576_v17, 0.7853982  ;;  %vm407_vm12 = vweird.f32 %v1125_v5 }
  0xbc   : > { %v668_v13 = vadd.s32 %v667_v8, %v658_v21  ;;  %v364_v62 = vshrl.u32 %v363_v61, 30 }
  0xbe   : > { %v672_v63 = vadd.s32 1, %v668_v13  ;;  %v365_v34 = vshll.u32 %v364_v62, 30  ;;  %v388_v47 = vsub.s32 4, %v364_v62 }
  0xc0   : > { %v673_v7 = vsel %vm671_vm3, %v672_v63, %v668_v13  ;;  %v366_v11 = vsub.s32 %v362_v58, %v365_v34  ;;  %v389_v54 = vsel %vm266_vm8, %v388_v47, %v364_v62  ;;  %vm887_vm3 = vcmask 64512  }
  0xc1   : > { %v674_v12 = vadd.s32 %v673_v7, %v669_v1  ;;  %v391_v58 = vsel %vm265_vm9, 0, %v389_v54 }
  0xc2   : > { %vm367_vm4 = vcmp.lt.s32.totalorder %v366_v11, 0  ;;  %v368_v35 = vsub.s32 0, %v366_v11  ;;  %v408_v6 = vadd.s32 3, %v391_v58 }
  0xc3   : > { %v675_v16 = vadd.s32 536870912, %v674_v12 }
  0xc4   : > { %v369_v60 = vsel %vm367_vm4, %v368_v35, %v366_v11 }
  0xc5   : > { %v370_v9 = vclz %v369_v60  ;;  %v1233_v4 = vshrl.u32 %v675_v16, 30  ;;  %v409_v16 = vand.u32 3, %v408_v6  ;;  %v565_v60 = vand.u32 3, %v391_v58 }
  0xc7   : > { %v1010_v10 = vadd.s32 4294967294, %v370_v9  ;;  %v677_v18 = vshll.u32 %v1233_v4, 30  ;;  %v700_v34 = vsub.s32 4, %v1233_v4  ;;  %vm410_vm13 = vcmp.lt.s32.totalorder %v409_v16, 2 }
  0xc8   : > { %vm566_vm14 = vcmp.lt.s32.totalorder %v565_v60, 2  ;;  %vm567_vm15 = vcmp.eq.s32.totalorder %v565_v60, 0  ;;  %vm570_vm0 = vcmp.eq.s32.totalorder %v565_v60, 2  ;;  %vm411_vm1 = vcmp.eq.s32.totalorder %v409_v16, 0 }
  0xc9   : > { %vm1011_vm5 = vcmp.lt.s32.totalorder %v1010_v10, 0  ;;  %v678_v19 = vsub.s32 %v674_v12, %v677_v18  ;;  %vm414_vm2 = vcmp.eq.s32.totalorder %v409_v16, 2 }
  0xca   : > { %v373_v20 = vsel %vm1011_vm5, 0, %v1010_v10 }
  0xcb   : > { %v374_v22 = vsub.s32 32, %v373_v20  ;;  %v378_v2 = vsub.s32 4294967266, %v373_v20  ;;  %vm679_vm6 = vcmp.lt.s32.totalorder %v678_v19, 0  ;;  %v680_v23 = vsub.s32 0, %v678_v19 }
  0xcc   : > { %v375_v25 = vshll.u32 %v366_v11, %v373_v20 }
  0xcd   : > { %v376_v27 = vshrl.u32 %v358_v3, %v374_v22  ;;  %v379_v28 = vadd.s32 127, %v378_v2  ;;  %v681_v29 = vsel %vm679_vm6, %v680_v23, %v678_v19 }
  0xce   : > { %v682_v38 = vclz %v681_v29 }
  0xcf   : > { %v377_v31 = vor.u32 %v376_v27, %v375_v25  ;;  %v380_v26 = vshll.u32 %v379_v28, 23  ;;  %v419_v28 = vstv %s241_s8 }
  0xd0   : > { %v1016_v33 = vadd.s32 4294967294, %v682_v38 }
  0xd1   : > { %v381_v40 = vor.u32 4788187, %v380_v26  ;;  %v384_v39 = vcvt.s32.f32 %v377_v31 }
  0xd2   : > { %vm1017_vm7 = vcmp.lt.s32.totalorder %v1016_v33, 0 }
  0xd3   : > { %v382_v36 = vand.u32 2147483647, %v381_v40  ;;  %v685_v30 = vsel %vm1017_vm7, 0, %v1016_v33 }
  0xd4   : > { %v686_v32 = vsub.s32 32, %v685_v30  ;;  %v690_v41 = vsub.s32 4294967266, %v685_v30  ;;  %v687_v45 = vshll.u32 %v678_v19, %v685_v30  ;;  %v701_v19 = vsel %vm578_vm10, %v700_v34, %v1233_v4 }
  0xd5   : > { %v385_v42 = vmul.f32 %v384_v39, %v382_v36  ;;  %v703_v25 = vsel %vm1243_vm11, 0, %v701_v19 }
  0xd6   : > { %v688_v46 = vshrl.u32 %v670_v43, %v686_v32  ;;  %v691_v15 = vadd.s32 127, %v690_v41  ;;  %v720_v30 = vadd.s32 3, %v703_v25  ;;  %v876_v47 = vand.u32 3, %v703_v25 }
  0xd7   : > { %v386_v44 = vxor.u32 2147483648, %v385_v42 }
  0xd8   : > { %v689_v49 = vor.u32 %v688_v46, %v687_v45  ;;  %v692_v50 = vshll.u32 %v691_v15, 23  ;;  %vm877_vm4 = vcmp.lt.s32.totalorder %v876_v47, 2  ;;  %vm878_vm5 = vcmp.eq.s32.totalorder %v876_v47, 0 }
  0xd9   : > { %v387_v48 = vsel %vm266_vm8, %v386_v44, %v385_v42 }
  0xda   : > { %v390_v51 = vsel %vm265_vm9, %v1125_v5, %v387_v48  ;;  %v693_v53 = vor.u32 4788187, %v692_v50  ;;  %v696_v37 = vcvt.s32.f32 %v689_v49  ;;  %v721_v48 = vand.u32 3, %v720_v30 }
  0xdb   : > { %v392_v52 = vmul.f32 %v390_v51, %v390_v51  ;;  %vm881_vm9 = vcmp.eq.s32.totalorder %v876_v47, 2 }
  0xdc   : > { %v694_v57 = vand.u32 2147483647, %v693_v53  ;;  %vm722_vm6 = vcmp.lt.s32.totalorder %v721_v48, 2  ;;  %vm723_vm7 = vcmp.eq.s32.totalorder %v721_v48, 0  ;;  %vm726_vm8 = vcmp.eq.s32.totalorder %v721_v48, 2 }
  0xdd   : > { %v393_v55 = vmul.f32 -0.001358992, %v392_v52  ;;  %v400_v56 = vmul.f32 -0.00019511016, %v392_v52 }
  0xde   : > { %v697_v8 = vmul.f32 %v696_v37, %v694_v57 }
  0xdf   : > { %v394_v59 = vadd.f32 0.041655596, %v393_v55  ;;  %v401_v21 = vadd.f32 0.008332121, %v400_v56 }
  0xe0   : > { %v698_v0 = vxor.u32 2147483648, %v697_v8 }
  0xe1   : > { %v395_v61 = vmul.f32 %v394_v59, %v392_v52  ;;  %v402_v24 = vmul.f32 %v401_v21, %v392_v52 }
  0xe2   : > { %v699_v1 = vsel %vm578_vm10, %v698_v0, %v697_v8  ;;  %vm719_vm10 = vweird.f32 %v1134_v14 }
  0xe3   : > { %v396_v13 = vadd.f32 -0.4999988, %v395_v61  ;;  %v403_v63 = vadd.f32 -0.16666654, %v402_v24  ;;  %v702_v7 = vsel %vm1243_vm11, %v1134_v14, %v699_v1  ;;  %vm893_vm11 = vcmask 130112  }
  0xe4   : > { %v704_v35 = vmul.f32 %v702_v7, %v702_v7 }
  0xe5   : > { %v397_v11 = vmul.f32 %v396_v13, %v392_v52  ;;  %v404_v12 = vmul.f32 %v403_v63, %v392_v52 }
  0xe6   : > { %v705_v10 = vmul.f32 -0.001358992, %v704_v35  ;;  %v712_v18 = vmul.f32 -0.00019511016, %v704_v35 }
  0xe7   : > { %v398_v9 = vadd.f32 1.0, %v397_v11  ;;  %v405_v17 = vadd.f32 1.0, %v404_v12 }
  0xe8   : > { %v706_v22 = vadd.f32 0.041655596, %v705_v10  ;;  %v713_v2 = vadd.f32 0.008332121, %v712_v18 }
  0xe9   : > { %v406_v20 = vmul.f32 %v405_v17, %v390_v51  ;;  %v415_v3 = vxor.u32 2147483648, %v398_v9 }
  0xea   : > { %v707_v27 = vmul.f32 %v706_v22, %v704_v35  ;;  %v714_v31 = vmul.f32 %v713_v2, %v704_v35 }
  0xeb   : > { %v412_v23 = vxor.u32 2147483648, %v406_v20  ;;  %v572_v29 = vsel %vm570_vm0, %v415_v3, %v406_v20  ;;  %v416_v38 = vsel %vm414_vm2, %v415_v3, %v406_v20 }
  0xec   : > { %v708_v40 = vadd.f32 -0.4999988, %v707_v27  ;;  %v715_v39 = vadd.f32 -0.16666654, %v714_v31 }
  0xed   : > { %v569_v26 = vsel %vm567_vm15, %v398_v9, %v412_v23  ;;  %v413_v4 = vsel %vm411_vm1, %v398_v9, %v412_v23 }
  0xee   : > { %v573_v33 = vsel %vm566_vm14, %v569_v26, %v572_v29  ;;  %v417_v36 = vsel %vm410_vm13, %v413_v4, %v416_v38  ;;  %v709_v32 = vmul.f32 %v708_v40, %v704_v35  ;;  %v716_v45 = vmul.f32 %v715_v39, %v704_v35 }
  0xef   : > { %v574_v42 = vsel %vm407_vm12, nan, %v573_v33  ;;  %v418_v43 = vsel %vm407_vm12, nan, %v417_v36  ;;  %vm899_vm12 = vcmask 195712   ;;  %vm905_vm13 = vcmask 261312  }
  0xf0   : > { %v575_v41 = vmul.f32 %v574_v42, %v419_v28  ;;  %v420_v44 = vmul.f32 %v419_v28, %v418_v43  ;;  %v710_v46 = vadd.f32 1.0, %v709_v32  ;;  %v717_v15 = vadd.f32 1.0, %v716_v45 }
  0xf1   : > { %vm909_vm14 = vcmask 257024  }
  0xf2   : > { %890 = vrot.lane.b32.xlu1 %v575_v41, %s1067_s9  ;;  %888 = vst.msk [vmem:[#allocation2] sm:$0xff] %vm887_vm3, %v420_v44  ;;  %v718_v49 = vmul.f32 %v717_v15, %v702_v7  ;;  %v727_v50 = vxor.u32 2147483648, %v710_v46 }
  0xf4   : > { %v724_v51 = vxor.u32 2147483648, %v718_v49  ;;  %v883_v52 = vsel %vm881_vm9, %v727_v50, %v718_v49  ;;  %v728_v54 = vsel %vm726_vm8, %v727_v50, %v718_v49 }
  0xf6   : > { %v880_v5 = vsel %vm878_vm5, %v710_v46, %v724_v51  ;;  %v725_v53 = vsel %vm723_vm7, %v710_v46, %v724_v51 }
  0xf7   : > { %v884_v55 = vsel %vm877_vm4, %v880_v5, %v883_v52  ;;  %v729_v56 = vsel %vm722_vm6, %v725_v53, %v728_v54 }
  0xf8   : > { %v885_v57 = vsel %vm719_vm10, nan, %v884_v55  ;;  %v730_v37 = vsel %vm719_vm10, nan, %v729_v56 }
  0xf9   : > { %v886_v58 = vmul.f32 %v885_v57, %v419_v28  ;;  %v731_v59 = vmul.f32 %v730_v37, %v419_v28 }
  0xfb   : > { %902 = vrot.lane.b32.xlu2 %v886_v58, %s1068_s10  ;;  %896 = vrot.lane.b32.xlu1 %v731_v59, %s1069_s11 }
 0x155   : > { %v903_v61 = vpop.permute.xlu2 %902 }
 0x164   : > { %v891_v21 = vpop.permute.xlu1 %890 }
 0x165   : > { %894 = vst.msk [vmem:[#allocation2] sm:$0xff] %vm893_vm11, %v891_v21 }
 0x16d   : > { %v897_v8 = vpop.permute.xlu1 %896 }
 0x16e   : > { %900 = vst.msk [vmem:[#allocation2] sm:$0xff] %vm899_vm12, %v897_v8 }
 0x16f   : > { %906 = vst.msk [vmem:[#allocation2] sm:$0xff] %vm905_vm13, %v903_v61 }
 0x176   : > { %v1044_v14 = vld [vmem:[#allocation2] ss:$0 sm:$0xff]  ;;  %v1045_v24 = vld [vmem:[#allocation2 + $0x1] ss:$0 sm:$0xff]  ;;  %v1046_v0 = vld [vmem:[#allocation2 + $0x2] ss:$0 sm:$0xff] }
 0x177   : > { %910 = vst.msk [vmem:[%s239_s16] sm:$0xf] %vm909_vm14, %v1044_v14  ;;  %v1047_v6 = vld [vmem:[#allocation2 + $0x3] ss:$0 sm:$0xff]  ;;  %v1048_v13 = vld [vmem:[#allocation2 + $0x4] ss:$0 sm:$0xff] }
 0x178   : > { %913 = vst.msk [vmem:[%s239_s16 + $0x4] sm:$0xf] %vm909_vm14, %v1045_v24  ;;  %v1049_v63 = vld [vmem:[#allocation2 + $0x5] ss:$0 sm:$0xff]  ;;  %v1050_v62 = vld [vmem:[#allocation2 + $0x6] ss:$0 sm:$0xff] }
 0x179   : > { %916 = vst.msk [vmem:[%s239_s16 + $0x8] sm:$0xf] %vm909_vm14, %v1046_v0  ;;  %v1051_v1 = vld [vmem:[#allocation2 + $0x7] ss:$0 sm:$0xff] }
 0x17a   : > { %919 = vst.msk [vmem:[%s239_s16 + $0xc] sm:$0xf] %vm909_vm14, %v1047_v6 }
 0x17b   : > { %922 = vst.msk [vmem:[%s239_s16 + $0x10] sm:$0xf] %vm909_vm14, %v1048_v13 }
 0x17c   : > { %925 = vst.msk [vmem:[%s239_s16 + $0x14] sm:$0xf] %vm909_vm14, %v1049_v63 }
 0x17d   : > { %928 = vst.msk [vmem:[%s239_s16 + $0x18] sm:$0xf] %vm909_vm14, %v1050_v62 }
 0x17e   : > { %931 = vst.msk [vmem:[%s239_s16 + $0x1c] sm:$0xf] %vm909_vm14, %v1051_v1 }
 0x17f PF: > { %s16_s20 = sadd.s32 1, %s1058_s20  }
 0x180   : > { %p13_p5 = scmp.ge.s32.totalorder %s16_s20, 4  }
 0x182   :  { %15 = sbr.rel (!%p13_p5) target bundleno = 2 (0x2), region = 73 }

</bundles_post_ra>
